<compile_context>
chip_gen: v7x
topology: tpu7x:2x2x1
jax: 0.10.0
libtpu: 0.0.40
codegen_flags: <defaults>
</compile_context>

<pallas_src>
import jax
import jax.numpy as jnp
from jax import lax
from jax.experimental import pallas as pl
from jax.experimental.pallas import tpu as pltpu

HIDDEN_SIZE = 768
MLP_HIDDEN = 32

# Contract the last dim of both operands (A @ B.T).
_NT_DIMS = (((1,), (1,)), ((), ()))


def _round_up(x, m):
    return (x + m - 1) // m * m


def _head_kernel(x_ref, w1_ref, b1_ref, w2_ref, b2_ref, o_ref):
    # x_ref : (TM, 768) bf16   block of pooled CLS embeddings
    # w1_ref: (768, 32) bf16   VMEM-resident across the whole grid
    # b1_ref: (1, 32)   f32
    # w2_ref: (1, 32)   f32    second linear's weight as a row vector
    # b2_ref: (1, 1)    f32
    # o_ref : (1, 1, TM) f32   lane-dense logits (batch on lanes)

    # Hoist parameter reads once per grid step.
    b1 = b1_ref[...]                      # (1, 32)
    w2 = w2_ref[...]                      # (1, 32)
    b2 = b2_ref[...]                      # (1, 1)

    # Linear(768 -> 32) + ReLU: bf16 operands straight into the MXU, f32 acc.
    h = jnp.dot(x_ref[...], w1_ref[...],
                preferred_element_type=jnp.float32) + b1        # (TM, 32) f32
    h = jnp.maximum(h, 0.0)

    # Dropout(p=0.1) is identity at inference time (module.eval()).

    # Linear(32 -> 1), folded into a lane-dense (1, TM) output block:
    #   out[0, m] = sum_k w2[0, k] * h[m, k] + b2
    out = lax.dot_general(w2, h, dimension_numbers=_NT_DIMS,
                          preferred_element_type=jnp.float32)   # (1, TM)
    o_ref[0] = out + b2


def custom_regressor_head(pooled, w1, b1, w2, b2, *, block_rows=1024):
    """Apply the CustomRegressor classifier head.

    pooled: (B, 768)    (any float dtype; cast to bf16 for the HBM-heavy read)
    w1:     (768, 32)   b1: (32,)
    w2:     (32, 1)     b2: (1,)
    returns (B, 1) float32
    """
    B = pooled.shape[0]
    block_rows = _round_up(block_rows, 16)
    # Tile rows; keep TM a multiple of 16 (bf16 sublane packing).
    TM = min(block_rows, _round_up(B, 16))
    B_pad = _round_up(B, TM)
    num_blocks = B_pad // TM

    # Ideally the upstream encoder already emits bf16 pooled outputs; the cast
    # is a no-op in that case.
    x = pooled.astype(jnp.bfloat16)
    if B_pad != B:
        x = jnp.pad(x, ((0, B_pad - B), (0, 0)))
    w1_bf = w1.astype(jnp.bfloat16)
    b1_row = b1.reshape(1, MLP_HIDDEN).astype(jnp.float32)
    w2_row = w2.reshape(1, MLP_HIDDEN).astype(jnp.float32)
    b2_2d = b2.reshape(1, 1).astype(jnp.float32)

    flops = 2 * B_pad * HIDDEN_SIZE * MLP_HIDDEN + 2 * B_pad * MLP_HIDDEN
    bytes_accessed = (B_pad * HIDDEN_SIZE * 2            # bf16 pooled read
                      + HIDDEN_SIZE * MLP_HIDDEN * 2     # bf16 W1
                      + (2 * MLP_HIDDEN + 1) * 4         # biases + W2
                      + B_pad * 4)                       # f32 logits write

    out = pl.pallas_call(
        _head_kernel,
        out_shape=jax.ShapeDtypeStruct((num_blocks, 1, TM), jnp.float32),
        grid=(num_blocks,),
        in_specs=[
            pl.BlockSpec((TM, HIDDEN_SIZE), lambda i: (i, 0)),           # pooled
            pl.BlockSpec((HIDDEN_SIZE, MLP_HIDDEN), lambda i: (0, 0)),   # W1
            pl.BlockSpec((1, MLP_HIDDEN), lambda i: (0, 0)),             # b1
            pl.BlockSpec((1, MLP_HIDDEN), lambda i: (0, 0)),             # W2 row
            pl.BlockSpec((1, 1), lambda i: (0, 0)),                      # b2
        ],
        out_specs=pl.BlockSpec((1, 1, TM), lambda i: (i, 0, 0)),
        compiler_params=pltpu.CompilerParams(
            dimension_semantics=("parallel",)),
        cost_estimate=pl.CostEstimate(flops=flops, transcendentals=0,
                                      bytes_accessed=bytes_accessed),
    )(x, w1_bf, b1_row, w2_row, b2_2d)

    # out[i, 0, m] is the logit for row i*TM + m; flatten and drop padding.
    return out.reshape(B_pad)[:B].reshape(B, 1)


def init_params(key):
    """Deterministic parameter init mirroring nn.Linear default (uniform)."""
    k1, k2, k3, k4 = jax.random.split(key, 4)
    bound1 = 1.0 / jnp.sqrt(jnp.float32(HIDDEN_SIZE))
    bound2 = 1.0 / jnp.sqrt(jnp.float32(MLP_HIDDEN))
    w1 = jax.random.uniform(k1, (HIDDEN_SIZE, MLP_HIDDEN), jnp.float32, -bound1, bound1)
    b1 = jax.random.uniform(k2, (MLP_HIDDEN,), jnp.float32, -bound1, bound1)
    w2 = jax.random.uniform(k3, (MLP_HIDDEN, 1), jnp.float32, -bound2, bound2)
    b2 = jax.random.uniform(k4, (1,), jnp.float32, -bound2, bound2)
    return w1, b1, w2, b2


if __name__ == "__main__":
    key = jax.random.PRNGKey(0)
    k_in, k_params = jax.random.split(key)

    batch = 2
    # Stand-in for the BERT pooler_output (B, hidden_size).
    pooled = jax.random.normal(k_in, (batch, HIDDEN_SIZE), dtype=jnp.float32)

    w1, b1, w2, b2 = init_params(k_params)

    logits = custom_regressor_head(pooled, w1, b1, w2, b2)
    jax.block_until_ready(logits)

    # Reference check (eval-mode forward) using the same bf16-cast activations.
    xf = pooled.astype(jnp.bfloat16).astype(jnp.float32)
    w1f = w1.astype(jnp.bfloat16).astype(jnp.float32)
    ref = jnp.maximum(xf @ w1f + b1, 0.0) @ w2 + b2

    assert logits.shape == (batch, 1)
    assert jnp.allclose(logits, ref, atol=2e-2, rtol=2e-2)

    print("KERNEL_OK")
</pallas_src>

<mosaic_0001>
module attributes {stable_mosaic.version = 11 : i64} {
  func.func @_head_kernel(%arg0: i32, %arg1: memref<16x768xbf16, #tpu.memory_space<vmem>>, %arg2: memref<768x32xbf16, #tpu.memory_space<vmem>>, %arg3: memref<1x32xf32, #tpu.memory_space<vmem>>, %arg4: memref<1x32xf32, #tpu.memory_space<vmem>>, %arg5: memref<1x1xf32, #tpu.memory_space<vmem>>, %arg6: memref<1x1x16xf32, #tpu.memory_space<vmem>>) attributes {dimension_semantics = [#tpu.dimension_semantics<parallel>], iteration_bounds = array<i64: 1>, scalar_prefetch = 0 : i64, scratch_operands = 0 : i64, tpu.core_type = #tpu.core_type<tc>, window_params = [{transform_indices = @transform_0, window_bounds = array<i64: 16, 768>}, {pipeline_mode = #tpu.pipeline_mode<synchronous>, transform_indices = @transform_1, window_bounds = array<i64: 768, 32>}, {pipeline_mode = #tpu.pipeline_mode<synchronous>, transform_indices = @transform_2, window_bounds = array<i64: 1, 32>}, {pipeline_mode = #tpu.pipeline_mode<synchronous>, transform_indices = @transform_3, window_bounds = array<i64: 1, 32>}, {pipeline_mode = #tpu.pipeline_mode<synchronous>, transform_indices = @transform_4, window_bounds = array<i64: 1, 1>}, {transform_indices = @transform_5, window_bounds = array<i64: 1, 1, 16>}]} {
    %c0 = arith.constant 0 : index
    %c0_0 = arith.constant 0 : index
    %0 = vector.load %arg3[%c0, %c0_0] : memref<1x32xf32, #tpu.memory_space<vmem>>, vector<1x32xf32>
    %c0_1 = arith.constant 0 : index
    %c0_2 = arith.constant 0 : index
    %1 = vector.load %arg4[%c0_1, %c0_2] : memref<1x32xf32, #tpu.memory_space<vmem>>, vector<1x32xf32>
    %c0_3 = arith.constant 0 : index
    %c0_4 = arith.constant 0 : index
    %2 = vector.load %arg5[%c0_3, %c0_4] : memref<1x1xf32, #tpu.memory_space<vmem>>, vector<1x1xf32>
    %c0_5 = arith.constant 0 : index
    %c0_6 = arith.constant 0 : index
    %3 = vector.load %arg1[%c0_5, %c0_6] : memref<16x768xbf16, #tpu.memory_space<vmem>>, vector<16x768xbf16>
    %c0_7 = arith.constant 0 : index
    %c0_8 = arith.constant 0 : index
    %4 = vector.load %arg2[%c0_7, %c0_8] : memref<768x32xbf16, #tpu.memory_space<vmem>>, vector<768x32xbf16>
    %cst = arith.constant dense<0.000000e+00> : vector<16x32xf32>
    %5 = tpu.matmul %3, %4, %cst {dimension_numbers = #tpu.dot_dimension_numbers<[1], [0], [0], [1], [0, 0, 1, 1], [], []>} : vector<16x768xbf16>, vector<768x32xbf16>, vector<16x32xf32> -> vector<16x32xf32>
    %6 = vector.broadcast %0 : vector<1x32xf32> to vector<16x32xf32>
    %7 = arith.addf %5, %6 : vector<16x32xf32>
    %cst_9 = arith.constant 0.000000e+00 : f32
    %8 = vector.broadcast %cst_9 : f32 to vector<16x32xf32>
    %9 = arith.maximumf %7, %8 : vector<16x32xf32>
    %cst_10 = arith.constant dense<0.000000e+00> : vector<1x16xf32>
    %10 = tpu.matmul %1, %9, %cst_10 {dimension_numbers = #tpu.dot_dimension_numbers<[1], [1], [0], [0], [0, 0, 1, 0], [], []>} : vector<1x32xf32>, vector<16x32xf32>, vector<1x16xf32> -> vector<1x16xf32>
    %11 = vector.broadcast %2 : vector<1x1xf32> to vector<1x16xf32>
    %12 = arith.addf %10, %11 : vector<1x16xf32>
    %c0_11 = arith.constant 0 : index
    %c0_12 = arith.constant 0 : index
    %c0_13 = arith.constant 0 : index
    %13 = vector.load %arg6[%c0_11, %c0_12, %c0_13] : memref<1x1x16xf32, #tpu.memory_space<vmem>>, vector<1x1x16xf32>
    %14 = vector.shape_cast %13 : vector<1x1x16xf32> to vector<1x16xf32>
    %15 = vector.shape_cast %12 : vector<1x16xf32> to vector<1x1x16xf32>
    tpu.vector_store %arg6[%c0_11, %c0_12, %c0_13], %15 {strides = array<i32>} : memref<1x1x16xf32, #tpu.memory_space<vmem>>, vector<1x1x16xf32>,
    return
  }
  func.func @transform_0(%arg0: i32) -> (i32, i32) {
    %c0_i32 = arith.constant 0 : i32
    %c0_i32_0 = arith.constant 0 : i32
    return %arg0, %c0_i32 : i32, i32
  }
  func.func @transform_1(%arg0: i32) -> (i32, i32) {
    %c0_i32 = arith.constant 0 : i32
    %c0_i32_0 = arith.constant 0 : i32
    %c0_i32_1 = arith.constant 0 : i32
    return %c0_i32, %c0_i32_0 : i32, i32
  }
  func.func @transform_2(%arg0: i32) -> (i32, i32) {
    %c0_i32 = arith.constant 0 : i32
    %c0_i32_0 = arith.constant 0 : i32
    %c0_i32_1 = arith.constant 0 : i32
    return %c0_i32, %c0_i32_0 : i32, i32
  }
  func.func @transform_3(%arg0: i32) -> (i32, i32) {
    %c0_i32 = arith.constant 0 : i32
    %c0_i32_0 = arith.constant 0 : i32
    %c0_i32_1 = arith.constant 0 : i32
    return %c0_i32, %c0_i32_0 : i32, i32
  }
  func.func @transform_4(%arg0: i32) -> (i32, i32) {
    %c0_i32 = arith.constant 0 : i32
    %c0_i32_0 = arith.constant 0 : i32
    %c0_i32_1 = arith.constant 0 : i32
    return %c0_i32, %c0_i32_0 : i32, i32
  }
  func.func @transform_5(%arg0: i32) -> (i32, i32, i32) {
    %c0_i32 = arith.constant 0 : i32
    %c0_i32_0 = arith.constant 0 : i32
    %c0_i32_1 = arith.constant 0 : i32
    return %arg0, %c0_i32, %c0_i32_0 : i32, i32, i32
  }
}

</mosaic_0001>

<bundles_post_ra>
// kernel: tpu_custom_call.1
= control target key start
LH: loop header
LB: loop body
LE: loop exit
PB: predicated region body
PF: predicated region fallthrough
CT: control target
= control target key end

     0   :  { %s1126_s0 = inlined_call_operand.vmem [shape: bf16[16,768], index: 0, kind: input, shape index: {}]   ;;  %s1127_s1 = inlined_call_operand.vmem [shape: bf16[768,32], index: 1, kind: input, shape index: {}]   ;;  %s1128_s2 = inlined_call_operand.vmem [shape: f32[1,32], index: 2, kind: input, shape index: {}]   ;;  %s1129_s3 = inlined_call_operand.vmem [shape: f32[1,32], index: 3, kind: input, shape index: {}]   ;;  %s1130_s4 = inlined_call_operand.<no memory space> [shape: f32[1,1], index: 4, kind: input, shape index: {}]   ;;  %s1131_s5 = inlined_call_operand.hbm [shape: f32[1,1,16], index: 5, kind: output, shape index: {}]  }
   0x1   :  { %v10_v0 = vstv %s1130_s4 }
   0x2   :  { %11 = vst [vmem:[#allocation2] sm:$0x1] %v10_v0 }
   0x3   :  { %v827_v1 = vld [vmem:[%s1127_s1 + $0x40] sm:$0xff]   ;;  %v831_v5 = vld [vmem:[%s1127_s1 + $0x48] sm:$0xff]   ;;  %v835_v9 = vld [vmem:[%s1127_s1 + $0x50] sm:$0xff]  }
   0x4   :  { %v828_v2 = vld [vmem:[%s1127_s1] sm:$0xff]   ;;  %741 = vmatprep.subr.bf16.mxu0 %v827_v1  ;;  %v832_v6 = vld [vmem:[%s1127_s1 + $0x8] sm:$0xff]   ;;  %v836_v10 = vld [vmem:[%s1127_s1 + $0x10] sm:$0xff]  }
   0x5   :  { %v829_v3 = vld [vmem:[%s1127_s1 + $0xc0] sm:$0xff]   ;;  %742 = vmatpush3.bf16.msra.mxu0 %v828_v2  ;;  %v833_v7 = vld [vmem:[%s1127_s1 + $0xc8] sm:$0xff]   ;;  %v837_v11 = vld [vmem:[%s1127_s1 + $0xd0] sm:$0xff]  }
   0x6   :  { %v830_v4 = vld [vmem:[%s1127_s1 + $0x80] sm:$0xff]   ;;  %763 = vmatprep.subr.bf16.mxu1 %v829_v3  ;;  %743 = vmatprep.subr.bf16.mxu0 %v831_v5  ;;  %v834_v8 = vld [vmem:[%s1127_s1 + $0x88] sm:$0xff]   ;;  %v838_v12 = vld [vmem:[%s1127_s1 + $0x90] sm:$0xff]  }
   0x7   :  { %764 = vmatpush3.bf16.msra.mxu1 %v830_v4  ;;  %v839_v13 = vld [vmem:[%s1127_s1 + $0x58] sm:$0xff]   ;;  %v843_v17 = vld [vmem:[%s1127_s1 + $0x60] sm:$0xff]   ;;  %v847_v21 = vld [vmem:[%s1127_s1 + $0x68] sm:$0xff]  }
   0x8   :  { %765 = vmatprep.subr.bf16.mxu1 %v833_v7  ;;  %v840_v14 = vld [vmem:[%s1127_s1 + $0x18] sm:$0xff]   ;;  %v844_v18 = vld [vmem:[%s1127_s1 + $0x20] sm:$0xff]   ;;  %v848_v22 = vld [vmem:[%s1127_s1 + $0x28] sm:$0xff]  }
   0x9   :  { %744 = vmatpush3.bf16.msra.mxu0 %v832_v6  ;;  %v841_v15 = vld [vmem:[%s1127_s1 + $0xd8] sm:$0xff]   ;;  %v845_v19 = vld [vmem:[%s1127_s1 + $0xe0] sm:$0xff]   ;;  %v849_v23 = vld [vmem:[%s1127_s1 + $0xe8] sm:$0xff]  }
   0xa   :  { %745 = vmatprep.subr.bf16.mxu0 %v835_v9  ;;  %v842_v16 = vld [vmem:[%s1127_s1 + $0x98] sm:$0xff]   ;;  %v846_v20 = vld [vmem:[%s1127_s1 + $0xa0] sm:$0xff]   ;;  %v850_v24 = vld [vmem:[%s1127_s1 + $0xa8] sm:$0xff]  }
   0xb   :  { %766 = vmatpush3.bf16.msra.mxu1 %v834_v8  ;;  %v851_v25 = vld [vmem:[%s1127_s1 + $0x70] sm:$0xff]   ;;  %v855_v29 = vld [vmem:[%s1127_s1 + $0x78] sm:$0xff]   ;;  %v862_v35 = vld [vmem:[%s1127_s1 + $0x140] sm:$0xff]  }
   0xc   :  { %767 = vmatprep.subr.bf16.mxu1 %v837_v11  ;;  %v852_v26 = vld [vmem:[%s1127_s1 + $0x30] sm:$0xff]   ;;  %v856_v30 = vld [vmem:[%s1127_s1 + $0x38] sm:$0xff]   ;;  %v863_v36 = vld [vmem:[%s1126_s0 + $0x8] ss:$24 sps:$4 sm:$0xff]  }
   0xd   :  { %746 = vmatpush3.bf16.msra.mxu0 %v836_v10  ;;  %v853_v27 = vld [vmem:[%s1127_s1 + $0xf0] sm:$0xff]   ;;  %v857_v31 = vld [vmem:[%s1127_s1 + $0xf8] sm:$0xff]   ;;  %v865_v37 = vld [vmem:[%s1126_s0 + $0xc] ss:$24 sps:$4 sm:$0xff]  }
   0xe   :  { %747 = vmatprep.subr.bf16.mxu0 %v839_v13  ;;  %v854_v28 = vld [vmem:[%s1127_s1 + $0xb0] sm:$0xff]   ;;  %v858_v32 = vld [vmem:[%s1126_s0] ss:$24 sps:$4 sm:$0xff]   ;;  %v860_v33 = vld [vmem:[%s1126_s0 + $0x4] ss:$24 sps:$4 sm:$0xff]   ;;  %526 = vmatprep.mubr.bf16.mxu1 %v865_v37 }
   0xf   :  { %768 = vmatpush3.bf16.msra.mxu1 %v838_v12  ;;  %v861_v34 = vld [vmem:[%s1127_s1 + $0xb8] sm:$0xff]   ;;  %485 = vmatprep.mubr.bf16.mxu0 %v860_v33  ;;  %v866_v38 = vld [vmem:[%s1127_s1 + $0x100] sm:$0xff]   ;;  %v867_v39 = vld [vmem:[%s1127_s1 + $0x148] sm:$0xff]  }
  0x10   :  { %769 = vmatprep.subr.bf16.mxu1 %v841_v15  ;;  %v868_v40 = vld [vmem:[%s1127_s1 + $0x108] sm:$0xff]   ;;  %v869_v41 = vld [vmem:[%s1127_s1 + $0x150] sm:$0xff]   ;;  %v871_v43 = vld [vmem:[%s1127_s1 + $0x158] sm:$0xff]  }
  0x11   :  { %748 = vmatpush3.bf16.msra.mxu0 %v840_v14  ;;  %v870_v42 = vld [vmem:[%s1127_s1 + $0x110] sm:$0xff]   ;;  %v872_v44 = vld [vmem:[%s1127_s1 + $0x118] sm:$0xff]   ;;  %v873_v45 = vld [vmem:[%s1127_s1 + $0x160] sm:$0xff]  }
  0x12   :  { %749 = vmatprep.subr.bf16.mxu0 %v843_v17  ;;  %v874_v46 = vld [vmem:[%s1127_s1 + $0x120] sm:$0xff]   ;;  %v875_v47 = vld [vmem:[%s1127_s1 + $0x168] sm:$0xff]  }
  0x13   :  { %770 = vmatpush3.bf16.msra.mxu1 %v842_v16  ;;  %v883_v48 = vld [vmem:[%s1126_s0 + $0x14] ss:$24 sps:$4 sm:$0xff]  }
  0x14   :  { %771 = vmatprep.subr.bf16.mxu1 %v845_v19 }
  0x15   :  { %750 = vmatpush3.bf16.msra.mxu0 %v844_v18 }
  0x16   :  { %751 = vmatprep.subr.bf16.mxu0 %v847_v21 }
  0x17   :  { %772 = vmatpush3.bf16.msra.mxu1 %v846_v20 }
  0x18   :  { %773 = vmatprep.subr.bf16.mxu1 %v849_v23 }
  0x19   :  { %752 = vmatpush3.bf16.msra.mxu0 %v848_v22 }
  0x1a   :  { %753 = vmatprep.subr.bf16.mxu0 %v851_v25 }
  0x1b   :  { %774 = vmatpush3.bf16.msra.mxu1 %v850_v24 }
  0x1c   :  { %775 = vmatprep.subr.bf16.mxu1 %v853_v27 }
  0x1d   :  { %754 = vmatpush3.bf16.msra.mxu0 %v852_v26 }
  0x1e   :  { %755 = vmatprep.subr.bf16.mxu0 %v855_v29 }
  0x1f   :  { %776 = vmatpush3.bf16.msra.mxu1 %v854_v28 }
  0x20   :  { %777 = vmatprep.subr.bf16.mxu1 %v857_v31 }
  0x21   :  { %756 = vmatpush3.bf16.msra.mxu0 %v856_v30 }
  0x22   :  { %785 = vmatprep.subr.bf16.mxu0 %v862_v35 }
  0x23   :  { %778 = vmatpush3.bf16.msra.mxu1 %v861_v34 }
  0x24   :  { %486 = vmatmul.mubr.bf16.vlgmr.msra.gmra.mrb[0].mxu0 %v858_v32 }
  0x25   :  { %786 = vmatpush3.bf16.msra.mxu0 %v866_v38 }
  0x26   :  { %527 = vmatmul.mubr.bf16.vlgmr.msra.gmra.mrb[0].mxu1 %v863_v36  ;;  %787 = vmatprep.subr.bf16.mxu0 %v867_v39 }
  0x29   :  { %788 = vmatpush3.bf16.msra.mxu0 %v868_v40 }
  0x2a   :  { %789 = vmatprep.subr.bf16.mxu0 %v869_v41 }
  0x2d   :  { %790 = vmatpush3.bf16.msra.mxu0 %v870_v42 }
  0x2e   :  { %791 = vmatprep.subr.bf16.mxu0 %v871_v43 }
  0x31   :  { %792 = vmatpush3.bf16.msra.mxu0 %v872_v44 }
  0x32   :  { %793 = vmatprep.subr.bf16.mxu0 %v873_v45 }
  0x33   :  { %12 = vsyncpa [#allocation4], 0  ;;  %567 = vmatprep.mubr.bf16.mxu0 %v883_v48  ;;  %v876_v49 = vld [vmem:[%s1127_s1 + $0x128] sm:$0xff]   ;;  %v877_v50 = vld [vmem:[%s1127_s1 + $0x170] sm:$0xff]   ;;  %v908_v55 = vmov 0.0|0.0   ;;  %vm909_vm0 = vmmov 0   ;;  %v583_v24 = vlaneseq }
  0x34   :  { %v878_v51 = vld [vmem:[%s1127_s1 + $0x130] sm:$0xff]   ;;  %v879_v52 = vld [vmem:[%s1127_s1 + $0x178] sm:$0xff]   ;;  %817 = vmatprep.subr.bf16.mxu1 %v908_v55  ;;  %v910_v56 = vmov 0.0   ;;  %v26_v57 = vld [vmem:[#allocation2] sm:$0x1]  ;;  %v911_v58 = vmov 0  }
  0x35   :  { %794 = vmatpush3.bf16.msra.mxu0 %v874_v46  ;;  %v880_v53 = vld [vmem:[%s1127_s1 + $0x138] sm:$0xff]   ;;  %v881_v54 = vld [vmem:[%s1126_s0 + $0x10] ss:$24 sps:$4 sm:$0xff]   ;;  %814 = vmatprep.mubr.msk.f32.mxu1 %vm909_vm0, %v910_v56  ;;  %v683_v60 = vld [vmem:[%s1128_s2] ss:$0 sm:$0xff]  ;;  %vm587_vm1 = vcmask 261120  }
  0x36   :  { %795 = vmatprep.subr.bf16.mxu0 %v875_v47  ;;  %826 = vset.pattern.permute.xlu0 %v911_v58  ;;  %vm819_vm2 = vmpackc.low %vm587_vm1, %vm587_vm1  ;;  %v25_v23 = vld [vmem:[%s1129_s3] sm:$0x1]  ;;  %v584_v25 = vshrl.u32 %v583_v24, 7  ;;  %s912_s2 = smov [#allocation3]   ;;  %vm667_vm3 = vcmask 122880  }
  0x37   :  { %580 = vperm.xlu0 %826, %v26_v57   ;;  %s675_s26 = sshll.u32 %s912_s2, 4  ;;  %s676_s26 = int_to_ptr.vmem [resolvable:$true] %s675_s26 }
  0x38   :  { %v585_v26 = vsub.s32 0, %v584_v25  ;;  %s884_s27 = scalar_lea.vmem %s676_s26, 16  ;;  %s888_s4 = scalar_lea.vmem %s676_s26, 32 }
  0x39   :  { %796 = vmatpush3.bf16.msra.mxu0 %v876_v49  ;;  %p885_p0 = scmp.ne.s32.totalorder %s676_s26, %s884_s27  ;;  %p889_p1 = scmp.lt.s32.totalorder %s676_s26, %s676_s26 }
  0x3a   :  { %797 = vmatprep.subr.bf16.mxu0 %v877_v50  ;;  %p890_p2 = scmp.lt.s32.totalorder %s888_s4, %s884_s27 }
  0x3c   :  { %p891_p3 = por %p890_p2, %p889_p1 }
  0x3d   :  { %798 = vmatpush3.bf16.msra.mxu0 %v878_v51 }
  0x3e   :  { %799 = vmatprep.subr.bf16.mxu0 %v879_v52  ;;  %p892_p4 = pnand %p891_p3, %p885_p0 }
  0x41   :  { %800 = vmatpush3.bf16.msra.mxu0 %v880_v53 }
  0x44   :  { %568 = vmatmul.mubr.bf16.vlgmr.msra.gmra.mrb[4].mxu0 %v881_v54 }
  0xb6   :  { %v581_v27 = vpop.permute.xlu0 %580 }
  0xb7   :  { %v586_v28 = vrot.slane %v581_v27, %v585_v26 }
  0xf7   :  { %v757_v59 = vpop.f32.mrb[0].mxu0 }
  0xf8   :  { %v758_v61 = vpop.f32.mrb[1].mxu0 }
  0xf9   :  { %v759_v62 = vadd.f32 %v758_v61, %v757_v59  ;;  %v760_v63 = vpop.f32.mrb[2].mxu0  ;;  %v779_v0 = vpop.f32.mrb[0].mxu1 }
  0xfa   :  { %v761_v1 = vpop.f32.mrb[3].mxu0  ;;  %v780_v4 = vpop.f32.mrb[1].mxu1 }
  0xfb   :  { %v488_v2 = vadd.f32 %v759_v62, %v683_v60  ;;  %v762_v3 = vadd.f32 %v761_v1, %v760_v63  ;;  %v781_v5 = vadd.f32 %v780_v4, %v779_v0  ;;  %v782_v6 = vpop.f32.mrb[2].mxu1 }
  0xfc   :  { %v783_v8 = vpop.f32.mrb[3].mxu1 }
  0xfd   :  { %v491_v7 = vadd.f32 %v762_v3, %v683_v60  ;;  %v529_v9 = vadd.f32 %v781_v5, %v488_v2  ;;  %v784_v10 = vadd.f32 %v783_v8, %v782_v6 }
  0xff   :  { %v532_v11 = vadd.f32 %v784_v10, %v491_v7 }
 0x117   :  { %v801_v12 = vpop.f32.mrb[4].mxu0 }
 0x118   :  { %v802_v13 = vpop.f32.mrb[5].mxu0 }
 0x119   :  { %v803_v14 = vadd.f32 %v802_v13, %v801_v12  ;;  %v804_v15 = vpop.f32.mrb[6].mxu0 }
 0x11a   :  { %v805_v16 = vpop.f32.mrb[7].mxu0 }
 0x11b   :  { %v570_v17 = vadd.f32 %v803_v14, %v529_v9  ;;  %v806_v18 = vadd.f32 %v805_v16, %v804_v15 }
 0x11d   :  { %v573_v19 = vadd.f32 %v806_v18, %v532_v11  ;;  %v576_v20 = vmax.f32 %v570_v17, 0.0 }
 0x11f   :  { %v577_v21 = vmax.f32 %v573_v19, 0.0 }
 0x121   :  { %v818_v22 = vpack.c.bf16 %v577_v21, %v576_v20 }
 0x123   :  { %820 = vmatpush3.bf16.xpose.msk.msra.mxu1 %vm819_vm2, %v818_v22 }
 0x12a   :  { %815 = vmatmul.mubr.msk.f32.vlgmr.msra.gmra.mrb[4].mxu1 %vm587_vm1, %v25_v23 }
 0x1fd   :  { %v663_v29 = vpop.f32.mrb[4].mxu1 }
 0x1fe   :  { %v664_v30 = vadd.f32 %v663_v29, %v586_v28  ;;  %v816_v31 = vpop.f32.mrb[5].mxu1 }
 0x200   :  { %668 = vst.msk [vmem:[#allocation3] sm:$0x1] %vm667_vm3, %v664_v30 }
 0x201   :  { %895 = shalt.err (!%p892_p4)
}
 0x202   :  { %s896_s29 = scalar_lea.hbm %s1131_s5, 16 }
 0x203   :  { %p897_p5 = scmp.ne.s32.totalorder %s1131_s5, %s896_s29  ;;  %p900_p6 = scmp.lt.u32.totalorder %s896_s29, %s1131_s5 }
 0x205   :  { %p902_p7 = pnand %p900_p6, %p897_p5 }
 0x207   :  { %905 = shalt.err (!%p902_p7)
}
 0x208   :  { %678 = dma.vmem_to_hbm [thread:$0]  %s676_s26, 16, %s1131_s5, [#allocation4]  }
 0x209   :  { %906 = dma.done.wait [#allocation4], 16  }
 0x20a   :  { %907 = vsyncadd [#allocation4], 4294967280 }
 0x20b   :  { %682 = vsyncpa [#allocation4], 1 }

</bundles_post_ra>
